<compile_context>
chip_gen: v7x
topology: tpu7x:2x2x1
jax: 0.10.0
libtpu: 0.0.40
codegen_flags: <defaults>
</compile_context>

<pallas_src>
import functools

import numpy as np
import jax
import jax.numpy as jnp
from jax.experimental import pallas as pl
from jax.experimental.pallas import tpu as pltpu


def _cdiv(a, b):
    return -(-a // b)


def _round_up(a, b):
    return _cdiv(a, b) * b


# --------------------------------------------------------------------------- kernel
def _psf_flat_conv_kernel(psf_ref, fin_ref, fout_ref, *, shifts, sl):
    """Tap-unrolled, register-resident flat convolution.

    psf_ref : SMEM (ntaps,) f32  -- PSF taps, row-major (kh*kw)
    fin_ref : VMEM (PB, Lin)     -- flat (row-major, halo-padded) input tiles
    fout_ref: VMEM (PB, Lout)    -- flat output tiles, Lout = n_strips * sl
    shifts  : static lane shift of every tap (a*SW + b), row-major
    """
    pb, lout = fout_ref.shape
    n_strips = lout // sl
    ntaps = len(shifts)

    # Hoist the SMEM tap reads out of the strip loops (scalars, reused everywhere).
    taps = [psf_ref[t] for t in range(ntaps)]

    # Strips are (<=8 sublane-planes, sl lanes) f32 <= 16 vregs: the accumulator and
    # the current tap load stay register-resident and each strip issues ONE aligned,
    # lane-dense store.  Every slice start below is a Python int (fully static), so
    # there is no dynamic minor-dim indexing and no sublane-misaligned slab: all row
    # shifts became lane shifts in the flat layout.
    for p0 in range(0, pb, 8):
        sp = min(8, pb - p0)
        for s in range(n_strips):
            l0 = s * sl
            acc = taps[0] * fin_ref[pl.ds(p0, sp), pl.ds(l0 + shifts[0], sl)]
            for t in range(1, ntaps):
                acc = acc + taps[t] * fin_ref[pl.ds(p0, sp), pl.ds(l0 + shifts[t], sl)]
            fout_ref[pl.ds(p0, sp), pl.ds(l0, sl)] = acc.astype(fout_ref.dtype)


# ----------------------------------------------------------------- sizing heuristics
def _vmem_limits():
    """(vmem_limit_bytes, block_budget_bytes), sized per TPU generation.

    v7x has 64 MiB VMEM per TensorCore -> keep the scoped limit <= 48 MiB; v5e/v6e
    have 128 MiB physical -> allow up to 96 MiB.  Block sizing uses ~half the limit,
    leaving headroom for Mosaic per-op temporaries and pipeline slack.
    """
    cap = 64 * 1024 * 1024                       # conservative default (v7x per-TC)
    try:
        cap = int(getattr(pltpu.get_tpu_info(), "vmem_capacity_bytes", cap)) or cap
    except Exception:                            # no TPU device / interpret mode
        pass
    limit = min(max(cap - 16 * 1024 * 1024, 32 * 1024 * 1024), 96 * 1024 * 1024)
    return limit, limit // 2


def _choose_row_tile(p, h, ph, sw, budget_bytes):
    """Output rows per 'virtual plane' (row tile).

    Splitting rows into more, shorter virtual planes (the 2*ph halo rows are
    duplicated in the wrapper) (a) bounds the per-grid-step flat length / trace size
    and (b) gives the 1-D parallel plane grid at least two blocks of 8 so both v7x
    TensorCores get work — but only while the row halo stays a small fraction of the
    tile (so v5e/v6e don't pay much extra HBM traffic for it).
    """
    th = h
    th_floor = max(1, 2 * ph)
    # (a) keep the per-step flat footprint / unrolled strip count sane
    while th > th_floor and (th + 2 * ph) * sw * 8 * 4 * 2 > budget_bytes:
        th = _cdiv(th, 2)
    while th > th_floor and th * sw > 32768:     # <= ~64 strips of 512 lanes per step
        th = _cdiv(th, 2)
    # (b) megacore balance: aim for >= 2 plane blocks of 8 when splitting is cheap
    while p * _cdiv(h, th) < 16 and th >= 4 * max(2 * ph, 1):
        th = _cdiv(th, 2)
    return th


def _choose_plane_block(pv, lin, lout, budget_bytes):
    """Virtual planes per grid step.

    Multiple of 8 (sublane tiling of the flat layout), as large as the
    double-buffered input+output footprint allows, while keeping >= 2 grid steps
    when enough planes exist.  The grid is cdiv-based with wrapper-side padding of
    the plane count — no divisor requirement on p.
    """
    if pv <= 8:
        return pv                               # full-dim block (legal below 8)
    per_plane = 2 * 4 * (lin + lout)            # double-buffered f32 input + output
    pb = min(pv, max(8, (budget_bytes // per_plane) // 8 * 8))
    if pv >= 16:                                # keep >= 2 grid steps for megacore
        pb = min(pb, max(8, (pv // 2) // 8 * 8))
    return pb


# ------------------------------------------------------------------------- wrapper
_TORCH_TO_JNP_PAD = {
    "replicate": "edge",
    "reflect": "reflect",
    "circular": "wrap",
    "constant": "constant",
    "zeros": "constant",
}


def psf_parameter_forward(x, psf, pad_mode="replicate"):
    """PSFParameter.forward, direct (non-FFT) 2-D path.

    x  : (N, C, H, W)
    psf: (kh, kw) float32  (the squeezed PSF parameter, i.e. weight (1,1,kh,kw))

    Returns the 'same'-size cross-correlation of every (n, c) plane with the shared
    single-channel PSF after pad_mode padding by k//2 per spatial dim.
    """
    n, c, h, w = x.shape
    kh, kw = psf.shape
    assert kh % 2 == 1 and kw % 2 == 1, "only odd PSF sizes supported"
    if pad_mode not in _TORCH_TO_JNP_PAD:
        raise ValueError(f"unsupported pad_mode {pad_mode!r}")
    jpad = _TORCH_TO_JNP_PAD[pad_mode]

    ph, pw = kh // 2, kw // 2
    p = n * c
    sw = w + 2 * pw                       # padded row width == flat row stride
    s_max = (kh - 1) * sw + (kw - 1)      # largest tap lane shift

    vmem_limit, budget = _vmem_limits()
    th = _choose_row_tile(p, h, ph, sw, budget)
    r = _cdiv(h, th)                      # row tiles per plane
    thp = th + 2 * ph                     # padded rows per row tile

    lout_valid = th * sw                  # flat output lanes actually used per tile
    sl = min(512, _round_up(lout_valid, 128))     # strip lane width (multiple of 128)
    n_strips = _cdiv(lout_valid, sl)
    lout = n_strips * sl                  # lane-dense output allocation per tile
    lin = lout + s_max                    # every tap read stays in bounds

    # ---- wrapper-side layout plumbing (pure data movement, fused by XLA) ----------
    x3 = x.reshape(p, h, w)
    xp = jnp.pad(x3, ((0, 0), (ph, ph), (pw, pw)), mode=jpad)           # conv halo
    xp = jnp.pad(xp, ((0, 0), (0, r * th - h), (0, 0)), mode="edge")    # row-tile align
    # Row tiles (duplicating the 2*ph halo rows), flattened row-major so every PSF tap
    # becomes one static lane shift of a*sw + b.
    tiles = jnp.stack([xp[:, i * th:i * th + thp, :] for i in range(r)], axis=1)
    fin = tiles.reshape(p * r, thp * sw)

    pv = p * r
    pb = _choose_plane_block(pv, lin, lout, budget)
    pp = _round_up(pv, pb)
    fin = jnp.pad(fin, ((0, pp - pv), (0, lin - thp * sw)), mode="edge")

    shifts = tuple(a * sw + b for a in range(kh) for b in range(kw))
    kernel = functools.partial(_psf_flat_conv_kernel, shifts=shifts, sl=sl)

    out = pl.pallas_call(
        kernel,
        out_shape=jax.ShapeDtypeStruct((pp, lout), x.dtype),
        grid_spec=pltpu.PrefetchScalarGridSpec(
            num_scalar_prefetch=0,
            grid=(pp // pb,),
            in_specs=[
                # PSF taps live in SMEM for cheap scalar reads inside the tap loop.
                pl.BlockSpec(memory_space=pltpu.MemorySpace.SMEM),
                pl.BlockSpec((pb, lin), lambda i: (i, 0)),
            ],
            out_specs=pl.BlockSpec((pb, lout), lambda i: (i, 0)),
        ),
        compiler_params=pltpu.CompilerParams(
            dimension_semantics=("parallel",),
            vmem_limit_bytes=vmem_limit,
        ),
    )(psf.astype(jnp.float32).reshape(-1), fin)

    # Unpack: (pp, lout) -> (p, r, th, sw) -> crop cols/rows -> (n, c, h, w)
    out = out[:pv, :th * sw].reshape(p, r, th, sw)[:, :, :, :w]
    out = out.reshape(p, r * th, w)[:, :h, :]
    return out.reshape(n, c, h, w)


# ---------------------------------------------------------------------------- test
if __name__ == "__main__":
    # The module's PSF weight is (1, 1, kh, kw) applied with groups=in_channels, i.e.
    # the same single-channel PSF filters every (n, c) plane independently.
    N, C, H, W = 2, 4, 16, 16
    KH = KW = 5          # 25 <= 100 -> fft == 'auto' resolves to False (direct path)

    key = jax.random.PRNGKey(0)
    x = jax.random.normal(key, (N, C, H, W), dtype=jnp.float32)

    # Deterministic PSF init: normalized 2-D Gaussian (typical PSF), standing in for
    # the squeezed kernel_psf handed to the module's __init__.
    yy, xx = np.mgrid[:KH, :KW]
    g = np.exp(-(((yy - KH // 2) ** 2 + (xx - KW // 2) ** 2) / (2.0 * 1.5 ** 2)))
    psf = jnp.asarray((g / g.sum()).astype(np.float32))

    out = jax.block_until_ready(psf_parameter_forward(x, psf))
    assert out.shape == (N, C, H, W) and out.dtype == x.dtype

    # Pure-JAX reference: replicate pad + VALID depthwise cross-correlation
    # (== torch.conv2d(pad(x), psf, groups=in_channels)).
    xpad_ref = jnp.pad(
        x, ((0, 0), (0, 0), (KH // 2, KH // 2), (KW // 2, KW // 2)), mode="edge")
    wgt = jnp.tile(psf[None, None], (C, 1, 1, 1))
    ref = jax.lax.conv_general_dilated(
        xpad_ref, wgt, window_strides=(1, 1), padding="VALID",
        dimension_numbers=("NCHW", "OIHW", "NCHW"), feature_group_count=C)
    np.testing.assert_allclose(np.asarray(out), np.asarray(ref), rtol=1e-5, atol=1e-5)

    print("KERNEL_OK")
</pallas_src>

<mosaic_0001>
module attributes {stable_mosaic.version = 11 : i64} {
  func.func @_psf_flat_conv_kernel(%arg0: i32, %arg1: memref<25xf32, #tpu.memory_space<smem>>, %arg2: memref<8x340xf32, #tpu.memory_space<vmem>>, %arg3: memref<8x256xf32, #tpu.memory_space<vmem>>) attributes {dimension_semantics = [#tpu.dimension_semantics<parallel>], iteration_bounds = array<i64: 2>, scalar_prefetch = 0 : i64, scratch_operands = 0 : i64, tpu.core_type = #tpu.core_type<tc>, window_params = [{transform_indices = @transform_0, window_bounds = array<i64: 25>}, {transform_indices = @transform_1, window_bounds = array<i64: 8, 340>}, {transform_indices = @transform_2, window_bounds = array<i64: 8, 256>}]} {
    %c0 = arith.constant 0 : index
    %0 = memref.load %arg1[%c0] : memref<25xf32, #tpu.memory_space<smem>>
    %c1 = arith.constant 1 : index
    %1 = memref.load %arg1[%c1] : memref<25xf32, #tpu.memory_space<smem>>
    %c2 = arith.constant 2 : index
    %2 = memref.load %arg1[%c2] : memref<25xf32, #tpu.memory_space<smem>>
    %c3 = arith.constant 3 : index
    %3 = memref.load %arg1[%c3] : memref<25xf32, #tpu.memory_space<smem>>
    %c4 = arith.constant 4 : index
    %4 = memref.load %arg1[%c4] : memref<25xf32, #tpu.memory_space<smem>>
    %c5 = arith.constant 5 : index
    %5 = memref.load %arg1[%c5] : memref<25xf32, #tpu.memory_space<smem>>
    %c6 = arith.constant 6 : index
    %6 = memref.load %arg1[%c6] : memref<25xf32, #tpu.memory_space<smem>>
    %c7 = arith.constant 7 : index
    %7 = memref.load %arg1[%c7] : memref<25xf32, #tpu.memory_space<smem>>
    %c8 = arith.constant 8 : index
    %8 = memref.load %arg1[%c8] : memref<25xf32, #tpu.memory_space<smem>>
    %c9 = arith.constant 9 : index
    %9 = memref.load %arg1[%c9] : memref<25xf32, #tpu.memory_space<smem>>
    %c10 = arith.constant 10 : index
    %10 = memref.load %arg1[%c10] : memref<25xf32, #tpu.memory_space<smem>>
    %c11 = arith.constant 11 : index
    %11 = memref.load %arg1[%c11] : memref<25xf32, #tpu.memory_space<smem>>
    %c12 = arith.constant 12 : index
    %12 = memref.load %arg1[%c12] : memref<25xf32, #tpu.memory_space<smem>>
    %c13 = arith.constant 13 : index
    %13 = memref.load %arg1[%c13] : memref<25xf32, #tpu.memory_space<smem>>
    %c14 = arith.constant 14 : index
    %14 = memref.load %arg1[%c14] : memref<25xf32, #tpu.memory_space<smem>>
    %c15 = arith.constant 15 : index
    %15 = memref.load %arg1[%c15] : memref<25xf32, #tpu.memory_space<smem>>
    %c16 = arith.constant 16 : index
    %16 = memref.load %arg1[%c16] : memref<25xf32, #tpu.memory_space<smem>>
    %c17 = arith.constant 17 : index
    %17 = memref.load %arg1[%c17] : memref<25xf32, #tpu.memory_space<smem>>
    %c18 = arith.constant 18 : index
    %18 = memref.load %arg1[%c18] : memref<25xf32, #tpu.memory_space<smem>>
    %c19 = arith.constant 19 : index
    %19 = memref.load %arg1[%c19] : memref<25xf32, #tpu.memory_space<smem>>
    %c20 = arith.constant 20 : index
    %20 = memref.load %arg1[%c20] : memref<25xf32, #tpu.memory_space<smem>>
    %c21 = arith.constant 21 : index
    %21 = memref.load %arg1[%c21] : memref<25xf32, #tpu.memory_space<smem>>
    %c22 = arith.constant 22 : index
    %22 = memref.load %arg1[%c22] : memref<25xf32, #tpu.memory_space<smem>>
    %c23 = arith.constant 23 : index
    %23 = memref.load %arg1[%c23] : memref<25xf32, #tpu.memory_space<smem>>
    %c24 = arith.constant 24 : index
    %24 = memref.load %arg1[%c24] : memref<25xf32, #tpu.memory_space<smem>>
    %c0_0 = arith.constant 0 : index
    %c0_1 = arith.constant 0 : index
    %25 = vector.load %arg2[%c0_0, %c0_1] : memref<8x340xf32, #tpu.memory_space<vmem>>, vector<8x256xf32>
    %26 = vector.broadcast %0 : f32 to vector<8x256xf32>
    %27 = arith.mulf %26, %25 : vector<8x256xf32>
    %c0_2 = arith.constant 0 : index
    %c1_3 = arith.constant 1 : index
    %28 = vector.load %arg2[%c0_2, %c1_3] : memref<8x340xf32, #tpu.memory_space<vmem>>, vector<8x256xf32>
    %29 = vector.broadcast %1 : f32 to vector<8x256xf32>
    %30 = arith.mulf %29, %28 : vector<8x256xf32>
    %31 = arith.addf %27, %30 : vector<8x256xf32>
    %c0_4 = arith.constant 0 : index
    %c2_5 = arith.constant 2 : index
    %32 = vector.load %arg2[%c0_4, %c2_5] : memref<8x340xf32, #tpu.memory_space<vmem>>, vector<8x256xf32>
    %33 = vector.broadcast %2 : f32 to vector<8x256xf32>
    %34 = arith.mulf %33, %32 : vector<8x256xf32>
    %35 = arith.addf %31, %34 : vector<8x256xf32>
    %c0_6 = arith.constant 0 : index
    %c3_7 = arith.constant 3 : index
    %36 = vector.load %arg2[%c0_6, %c3_7] : memref<8x340xf32, #tpu.memory_space<vmem>>, vector<8x256xf32>
    %37 = vector.broadcast %3 : f32 to vector<8x256xf32>
    %38 = arith.mulf %37, %36 : vector<8x256xf32>
    %39 = arith.addf %35, %38 : vector<8x256xf32>
    %c0_8 = arith.constant 0 : index
    %c4_9 = arith.constant 4 : index
    %40 = vector.load %arg2[%c0_8, %c4_9] : memref<8x340xf32, #tpu.memory_space<vmem>>, vector<8x256xf32>
    %41 = vector.broadcast %4 : f32 to vector<8x256xf32>
    %42 = arith.mulf %41, %40 : vector<8x256xf32>
    %43 = arith.addf %39, %42 : vector<8x256xf32>
    %c0_10 = arith.constant 0 : index
    %c20_11 = arith.constant 20 : index
    %44 = vector.load %arg2[%c0_10, %c20_11] : memref<8x340xf32, #tpu.memory_space<vmem>>, vector<8x256xf32>
    %45 = vector.broadcast %5 : f32 to vector<8x256xf32>
    %46 = arith.mulf %45, %44 : vector<8x256xf32>
    %47 = arith.addf %43, %46 : vector<8x256xf32>
    %c0_12 = arith.constant 0 : index
    %c21_13 = arith.constant 21 : index
    %48 = vector.load %arg2[%c0_12, %c21_13] : memref<8x340xf32, #tpu.memory_space<vmem>>, vector<8x256xf32>
    %49 = vector.broadcast %6 : f32 to vector<8x256xf32>
    %50 = arith.mulf %49, %48 : vector<8x256xf32>
    %51 = arith.addf %47, %50 : vector<8x256xf32>
    %c0_14 = arith.constant 0 : index
    %c22_15 = arith.constant 22 : index
    %52 = vector.load %arg2[%c0_14, %c22_15] : memref<8x340xf32, #tpu.memory_space<vmem>>, vector<8x256xf32>
    %53 = vector.broadcast %7 : f32 to vector<8x256xf32>
    %54 = arith.mulf %53, %52 : vector<8x256xf32>
    %55 = arith.addf %51, %54 : vector<8x256xf32>
    %c0_16 = arith.constant 0 : index
    %c23_17 = arith.constant 23 : index
    %56 = vector.load %arg2[%c0_16, %c23_17] : memref<8x340xf32, #tpu.memory_space<vmem>>, vector<8x256xf32>
    %57 = vector.broadcast %8 : f32 to vector<8x256xf32>
    %58 = arith.mulf %57, %56 : vector<8x256xf32>
    %59 = arith.addf %55, %58 : vector<8x256xf32>
    %c0_18 = arith.constant 0 : index
    %c24_19 = arith.constant 24 : index
    %60 = vector.load %arg2[%c0_18, %c24_19] : memref<8x340xf32, #tpu.memory_space<vmem>>, vector<8x256xf32>
    %61 = vector.broadcast %9 : f32 to vector<8x256xf32>
    %62 = arith.mulf %61, %60 : vector<8x256xf32>
    %63 = arith.addf %59, %62 : vector<8x256xf32>
    %c0_20 = arith.constant 0 : index
    %c40 = arith.constant 40 : index
    %64 = vector.load %arg2[%c0_20, %c40] : memref<8x340xf32, #tpu.memory_space<vmem>>, vector<8x256xf32>
    %65 = vector.broadcast %10 : f32 to vector<8x256xf32>
    %66 = arith.mulf %65, %64 : vector<8x256xf32>
    %67 = arith.addf %63, %66 : vector<8x256xf32>
    %c0_21 = arith.constant 0 : index
    %c41 = arith.constant 41 : index
    %68 = vector.load %arg2[%c0_21, %c41] : memref<8x340xf32, #tpu.memory_space<vmem>>, vector<8x256xf32>
    %69 = vector.broadcast %11 : f32 to vector<8x256xf32>
    %70 = arith.mulf %69, %68 : vector<8x256xf32>
    %71 = arith.addf %67, %70 : vector<8x256xf32>
    %c0_22 = arith.constant 0 : index
    %c42 = arith.constant 42 : index
    %72 = vector.load %arg2[%c0_22, %c42] : memref<8x340xf32, #tpu.memory_space<vmem>>, vector<8x256xf32>
    %73 = vector.broadcast %12 : f32 to vector<8x256xf32>
    %74 = arith.mulf %73, %72 : vector<8x256xf32>
    %75 = arith.addf %71, %74 : vector<8x256xf32>
    %c0_23 = arith.constant 0 : index
    %c43 = arith.constant 43 : index
    %76 = vector.load %arg2[%c0_23, %c43] : memref<8x340xf32, #tpu.memory_space<vmem>>, vector<8x256xf32>
    %77 = vector.broadcast %13 : f32 to vector<8x256xf32>
    %78 = arith.mulf %77, %76 : vector<8x256xf32>
    %79 = arith.addf %75, %78 : vector<8x256xf32>
    %c0_24 = arith.constant 0 : index
    %c44 = arith.constant 44 : index
    %80 = vector.load %arg2[%c0_24, %c44] : memref<8x340xf32, #tpu.memory_space<vmem>>, vector<8x256xf32>
    %81 = vector.broadcast %14 : f32 to vector<8x256xf32>
    %82 = arith.mulf %81, %80 : vector<8x256xf32>
    %83 = arith.addf %79, %82 : vector<8x256xf32>
    %c0_25 = arith.constant 0 : index
    %c60 = arith.constant 60 : index
    %84 = vector.load %arg2[%c0_25, %c60] : memref<8x340xf32, #tpu.memory_space<vmem>>, vector<8x256xf32>
    %85 = vector.broadcast %15 : f32 to vector<8x256xf32>
    %86 = arith.mulf %85, %84 : vector<8x256xf32>
    %87 = arith.addf %83, %86 : vector<8x256xf32>
    %c0_26 = arith.constant 0 : index
    %c61 = arith.constant 61 : index
    %88 = vector.load %arg2[%c0_26, %c61] : memref<8x340xf32, #tpu.memory_space<vmem>>, vector<8x256xf32>
    %89 = vector.broadcast %16 : f32 to vector<8x256xf32>
    %90 = arith.mulf %89, %88 : vector<8x256xf32>
    %91 = arith.addf %87, %90 : vector<8x256xf32>
    %c0_27 = arith.constant 0 : index
    %c62 = arith.constant 62 : index
    %92 = vector.load %arg2[%c0_27, %c62] : memref<8x340xf32, #tpu.memory_space<vmem>>, vector<8x256xf32>
    %93 = vector.broadcast %17 : f32 to vector<8x256xf32>
    %94 = arith.mulf %93, %92 : vector<8x256xf32>
    %95 = arith.addf %91, %94 : vector<8x256xf32>
    %c0_28 = arith.constant 0 : index
    %c63 = arith.constant 63 : index
    %96 = vector.load %arg2[%c0_28, %c63] : memref<8x340xf32, #tpu.memory_space<vmem>>, vector<8x256xf32>
    %97 = vector.broadcast %18 : f32 to vector<8x256xf32>
    %98 = arith.mulf %97, %96 : vector<8x256xf32>
    %99 = arith.addf %95, %98 : vector<8x256xf32>
    %c0_29 = arith.constant 0 : index
    %c64 = arith.constant 64 : index
    %100 = vector.load %arg2[%c0_29, %c64] : memref<8x340xf32, #tpu.memory_space<vmem>>, vector<8x256xf32>
    %101 = vector.broadcast %19 : f32 to vector<8x256xf32>
    %102 = arith.mulf %101, %100 : vector<8x256xf32>
    %103 = arith.addf %99, %102 : vector<8x256xf32>
    %c0_30 = arith.constant 0 : index
    %c80 = arith.constant 80 : index
    %104 = vector.load %arg2[%c0_30, %c80] : memref<8x340xf32, #tpu.memory_space<vmem>>, vector<8x256xf32>
    %105 = vector.broadcast %20 : f32 to vector<8x256xf32>
    %106 = arith.mulf %105, %104 : vector<8x256xf32>
    %107 = arith.addf %103, %106 : vector<8x256xf32>
    %c0_31 = arith.constant 0 : index
    %c81 = arith.constant 81 : index
    %108 = vector.load %arg2[%c0_31, %c81] : memref<8x340xf32, #tpu.memory_space<vmem>>, vector<8x256xf32>
    %109 = vector.broadcast %21 : f32 to vector<8x256xf32>
    %110 = arith.mulf %109, %108 : vector<8x256xf32>
    %111 = arith.addf %107, %110 : vector<8x256xf32>
    %c0_32 = arith.constant 0 : index
    %c82 = arith.constant 82 : index
    %112 = vector.load %arg2[%c0_32, %c82] : memref<8x340xf32, #tpu.memory_space<vmem>>, vector<8x256xf32>
    %113 = vector.broadcast %22 : f32 to vector<8x256xf32>
    %114 = arith.mulf %113, %112 : vector<8x256xf32>
    %115 = arith.addf %111, %114 : vector<8x256xf32>
    %c0_33 = arith.constant 0 : index
    %c83 = arith.constant 83 : index
    %116 = vector.load %arg2[%c0_33, %c83] : memref<8x340xf32, #tpu.memory_space<vmem>>, vector<8x256xf32>
    %117 = vector.broadcast %23 : f32 to vector<8x256xf32>
    %118 = arith.mulf %117, %116 : vector<8x256xf32>
    %119 = arith.addf %115, %118 : vector<8x256xf32>
    %c0_34 = arith.constant 0 : index
    %c84 = arith.constant 84 : index
    %120 = vector.load %arg2[%c0_34, %c84] : memref<8x340xf32, #tpu.memory_space<vmem>>, vector<8x256xf32>
    %121 = vector.broadcast %24 : f32 to vector<8x256xf32>
    %122 = arith.mulf %121, %120 : vector<8x256xf32>
    %123 = arith.addf %119, %122 : vector<8x256xf32>
    %c0_35 = arith.constant 0 : index
    %c0_36 = arith.constant 0 : index
    %124 = vector.load %arg3[%c0_35, %c0_36] : memref<8x256xf32, #tpu.memory_space<vmem>>, vector<8x256xf32>
    tpu.vector_store %arg3[%c0_35, %c0_36], %123 {strides = array<i32>} : memref<8x256xf32, #tpu.memory_space<vmem>>, vector<8x256xf32>,
    return
  }
  func.func @transform_0(%arg0: i32) -> i32 {
    %c0_i32 = arith.constant 0 : i32
    %c0_i32_0 = arith.constant 0 : i32
    return %c0_i32 : i32
  }
  func.func @transform_1(%arg0: i32) -> (i32, i32) {
    %c0_i32 = arith.constant 0 : i32
    %c0_i32_0 = arith.constant 0 : i32
    return %arg0, %c0_i32 : i32, i32
  }
  func.func @transform_2(%arg0: i32) -> (i32, i32) {
    %c0_i32 = arith.constant 0 : i32
    %c0_i32_0 = arith.constant 0 : i32
    return %arg0, %c0_i32 : i32, i32
  }
}

</mosaic_0001>

<bundles_post_ra>
// kernel: tpu_custom_call.1
= control target key start
LH: loop header
LB: loop body
LE: loop exit
PB: predicated region body
PF: predicated region fallthrough
CT: control target
= control target key end

     0   :  { %7 = vsyncpa [#allocation5], 0  ;;  %s1347_s0 = inlined_call_operand.hbm [shape: f32[25], index: 0, kind: input, shape index: {}]   ;;  %s1348_s1 = inlined_call_operand.hbm [shape: f32[16,340], index: 1, kind: input, shape index: {}]   ;;  %s1349_s2 = inlined_call_operand.hbm [shape: f32[16,256], index: 2, kind: output, shape index: {}]  }
   0x1   :  { %8 = vsyncpa [#allocation3], 0 }
   0x2   :  { %10 = vsyncpa [#allocation3 + $0x1], 0 }
   0x3   :  { %11 = vsyncpa [#allocation4], 0 }
   0x4   :  { %13 = vsyncpa [#allocation4 + $0x1], 0  ;;  %s1061_s9 = smov 0   ;;  %s1063_s10 = smov 0  }
   0x5   :  { %s1065_s11 = smov 0   ;;  %s1067_s12 = smov 0  }
   0x6 LB: > { %s1082_s13 = sadd.s32 4294967295, %s1017_s12   ;;  %s782_s14 = sadd.s32 4294967294, %s1017_s12   ;;  %s1017_s12 = sphi %s1067_s12, %s1370_s12   ;;  %s1013_s11 = sphi %s1065_s11, %s1369_s11   ;;  %s1009_s10 = sphi %s1063_s10, %s1368_s10   ;;  %s1005_s9 = sphi %s1061_s9, %s1367_s9  }
   0x7   : > { %p60_p0 = scmp.ne.s32.totalorder %s1009_s10, %s1005_s9  ;;  %p1350_p1 = scmp.eq.s32.totalorder %s1082_s13, 0 }
   0x8   : > { %p90_p3 = scmp.eq.s32.totalorder %s782_s14, 1  ;;  %p783_p5 = scmp.ge.s32.totalorder %s1017_s12, 1 }
   0x9   : > { %p1091_p4 = por %p1350_p1, %p60_p0  ;;  %p97_p7 = scmp.lt.s32.totalorder %s1017_s12, 3 }
   0xa   : > { %p1096_p6 = por %p90_p3, %p60_p0  ;;  %s1107_s18 = sadd.s32 1, %s1017_s12  }
   0xb   : > { %s1353_s15 = scalar_select %p1091_p4, 1, 0 }
   0xc   : > { %s1354_s16 = scalar_select %p1096_p6, 1, 0 }
   0xd   : > { %p1101_p8 = pnand %p783_p5, %p97_p7  ;;  %s44_s19 = ssub.s32 %s1017_s12, %s1107_s18 }
   0xe   : > { %s47_s20 = sadd.s32 1, %s1013_s11  ;;  %p1120_p12 = scmp.eq.s32.totalorder %s44_s19, 0 }
   0xf   : > { %p831_p10 = pneg %p1101_p8  ;;  %p54_p13 = scmp.ne.s32.totalorder %s1013_s11, %s1009_s10 }
  0x10   : > { %p55_p0 = scmp.eq.s32.totalorder %s1017_s12, 0  ;;  %p844_p3 = scmp.lt.s32.totalorder %s1017_s12, 2 }
  0x11   : > { %p1116_p11 = pnand %p831_p10, %p1350_p1  ;;  %s904_s25 = scalar_lea.hbm %s1347_s0, 16 }
  0x12   : > { %p905_p5 = scmp.ne.s32.totalorder %s1347_s0, %s904_s25  ;;  %p911_p1 = scmp.lt.u32.totalorder %s904_s25, %s1347_s0 }
  0x13   : > { %p906_p7 = pneg %p1116_p11 }
  0x15   : > { %p907_p10 = pnand %p906_p7, %p905_p5 }
  0x17   : > { %p908_p9 = pneg %p907_p10 }
  0x19   : > { %p913_p2 = pnand %p911_p1, %p908_p9 }
  0x1b   : > { %916 = shalt.err (!%p913_p2)
}
  0x1c   : > { %s1019_s30 = smov [#allocation2]   ;;  %p56_p1 = por %p55_p0, %p54_p13 }
  0x1d   : > { %834 = dma.hbm_to_smem (!%p1116_p11), %s1347_s0, 16, %s1019_s30, [#allocation5]  }
  0x1e   : > { %s1147_s5 = scalar_select %p1120_p12, %s1013_s11, %s47_s20  }
  0x1f   : > { %p1358_p2 = scmp.eq.s32.totalorder %s1082_s13, 1  ;;  %s119_s7 = sand.u32 1, %s1013_s11  }
  0x20   : > { %s821_s8 = smul.u32 384, %s1017_s12  ;;  %p1167_p5 = pnand %p844_p3, %p56_p1 }
  0x21   : > { %p1159_p9 = por %p1358_p2, %p54_p13  ;;  %s820_s14 = smul.u32 24, %s119_s7 }
  0x22   : > { %s1174_s22 = scalar_lea.hbm %s1348_s1, %s821_s8  ;;  %s120_s25 = scalar_lea.sflag [#allocation3], %s119_s7 }
  0x23   : > { %s1359_s6 = scalar_select %p1159_p9, 1, 0 }
  0x24   : > { %s123_s23 = scalar_lea.vmem [#allocation6], %s820_s14  ;;  %s917_s26 = scalar_lea.hbm %s1174_s22, 384 }
  0x25   : > { %s131_s24 = sshll.u32 %s123_s23, 4  ;;  %p918_p11 = scmp.ne.s32.totalorder %s1174_s22, %s917_s26  ;;  %s1176_s24 = int_to_ptr.vmem [resolvable:$true] %s131_s24 }
  0x26   : > { %p919_p12 = pneg %p1167_p5  ;;  %s922_s29 = scalar_lea.hbm %s1348_s1, 768 }
  0x27   : > { %p923_p3 = scmp.lt.u32.totalorder %s1174_s22, %s1348_s1  ;;  %p924_p7 = scmp.lt.u32.totalorder %s922_s29, %s917_s26 }
  0x28   : > { %p920_p13 = pnand %p919_p12, %p918_p11  ;;  %p926_p1 = scmp.lt.u32.totalorder %s917_s26, %s1174_s22 }
  0x29   : > { %p925_p10 = por %p924_p7, %p923_p3 }
  0x2a   : > { %p921_p0 = pneg %p920_p13 }
  0x2b   : > { %p927_p2 = por %p926_p1, %p925_p10 }
  0x2d   : > { %p928_p6 = pnand %p927_p2, %p921_p0 }
  0x2f   : > { %931 = shalt.err (!%p928_p6)
}
  0x30   : > { %s932_s4 = scalar_lea.vmem %s1176_s24, 384  ;;  %s1020_s7 = smov [#allocation6]  }
  0x31   : > { %p933_p11 = scmp.ne.s32.totalorder %s1176_s24, %s932_s4  ;;  %s937_s8 = sshll.u32 %s1020_s7, 4  ;;  %s938_s8 = int_to_ptr.vmem [resolvable:$false] %s937_s8 }
  0x32   : > { %s939_s14 = scalar_lea.vmem %s938_s8, 768  ;;  %p940_p4 = scmp.lt.s32.totalorder %s1176_s24, %s938_s8 }
  0x33   : > { %p935_p13 = pnand %p933_p11, %p919_p12  ;;  %p941_p3 = scmp.lt.s32.totalorder %s939_s14, %s932_s4 }
  0x35   : > { %p936_p9 = pneg %p935_p13  ;;  %p942_p7 = por %p941_p3, %p940_p4 }
  0x37   : > { %p943_p10 = pnand %p942_p7, %p936_p9 }
  0x39   : > { %946 = shalt.err (!%p943_p10)
}
  0x3a   : > { %838 = dma.hbm_to_vmem [thread:$0]  (!%p1167_p5), %s1174_s22, 384, %s1176_s24, %s120_s25  }
  0x3b   : > { %140 = sbr.rel (%p1101_p8) target bundleno = 355 (0x163), region = 28  ;;  %p1361_p6 = scmp.eq.s32.totalorder (!%p1101_p8), %s1082_s13, 0 }
  0x42   : > { %992 = dma.done.wait (%p1361_p6), [#allocation5], 16   ;;  %p1362_p12 = pmov %p1361_p6 }
  0x43   : > { %s1210_s21 = sand.u32 1, %s1009_s10   ;;  %p1363_p4 = scmp.ne.s32.totalorder %s1353_s15, 0 }
  0x44   : > { %994 = vsyncadd (%p1362_p12), [#allocation5], 4294967280  ;;  %s822_s20 = smul.u32 24, %s1210_s21  ;;  %s147_s19 = scalar_lea.sflag [#allocation3], %s1210_s21 }
  0x46   : > { %s150_s23 = scalar_lea.vmem [#allocation6], %s822_s20 }
  0x47   : > { %996 = dma.done.wait (%p1363_p4), %s147_s19, 384  }
  0x48   : > { %998 = vsyncadd (%p1363_p4), %s147_s19, 4294966912 }
  0x49   : > { %155 = sfence }
  0x4a   : > { %s790_s17 = sld [smem:[#allocation2 + $0x1]]  ;;  %s791_s22 = sld [smem:[#allocation2 + $0x2]]  ;;  %v1218_v0 = vld [vmem:[%s150_s23 + $0x10] sm:$0xff]  ;;  %v1220_v1 = vld [vmem:[%s150_s23] sm:$0xff]  ;;  %v1222_v3 = vld [vmem:[%s150_s23 + $0x8] sm:$0xff]  ;;  %vm216_vm0 = vcmask 1039360  }
  0x4b   : > { %s792_s24 = sld [smem:[#allocation2 + $0x3]]  ;;  %s1021_s25 = smov 127   ;;  %vm236_vm1 = vcmask 1031168   ;;  %vm256_vm2 = vcmask 1022976   ;;  %vm276_vm3 = vcmask 1014784   ;;  %vm296_vm4 = vcmask 883712  }
  0x4c   : > { %s793_s15 = sld [smem:[#allocation2 + $0x4]]  ;;  %s1022_s26 = smov 126   ;;  %vm316_vm5 = vcmask 875520   ;;  %vm336_vm6 = vcmask 867328   ;;  %vm356_vm7 = vcmask 859136   ;;  %vm376_vm8 = vcmask 850944  }
  0x4d   : > { %s794_s27 = sld [smem:[#allocation2 + $0x5]]  ;;  %s1023_s28 = smov 125   ;;  %vm396_vm9 = vcmask 719872   ;;  %vm416_vm10 = vcmask 711680   ;;  %vm436_vm11 = vcmask 703488   ;;  %vm456_vm12 = vcmask 695296  }
  0x4e   : > { %s795_s29 = sld [smem:[#allocation2 + $0x6]]  ;;  %s1024_s30 = smov 124   ;;  %vm476_vm13 = vcmask 687104   ;;  %vm496_vm14 = vcmask 556032   ;;  %vm516_vm15 = vcmask 547840  }
  0x4f   : > { %s796_s3 = sld [smem:[#allocation2 + $0x7]]  ;;  %s1025_s4 = smov 108  }
  0x50   : > { %v203_v2 = vstv %s790_s17  ;;  %v223_v6 = vstv %s791_s22  ;;  %s797_s7 = sld [smem:[#allocation2 + $0x8]]  ;;  %s1026_s8 = smov 107  }
  0x51   : > { %v206_v4 = vmul.f32 %v203_v2, %v1218_v0  ;;  %v204_v5 = vmul.f32 %v203_v2, %v1220_v1  ;;  %v224_v7 = vmul.f32 %v223_v6, %v1220_v1  ;;  %v205_v8 = vmul.f32 %v203_v2, %v1222_v3  ;;  %s798_s14 = sld [smem:[#allocation2 + $0x9]]  ;;  %s1027_s20 = smov 106  }
  0x52   : > { %v226_v9 = vmul.f32 %v223_v6, %v1218_v0  ;;  %v225_v10 = vmul.f32 %v223_v6, %v1222_v3  ;;  %v243_v11 = vstv %s792_s24  ;;  %v263_v14 = vstv %s793_s15  ;;  %s799_s19 = sld [smem:[#allocation2 + $0xa]]  ;;  %s1028_s23 = smov 105  }
  0x53   : > { %214 = vrot.lane.b32.xlu1 %v206_v4, %s1021_s25  ;;  %210 = vrot.lane.b32.xlu0 %v204_v5, %s1021_s25  ;;  %v245_v12 = vmul.f32 %v243_v11, %v1222_v3  ;;  %v244_v13 = vmul.f32 %v243_v11, %v1220_v1  ;;  %v264_v15 = vmul.f32 %v263_v14, %v1220_v1  ;;  %v283_v19 = vstv %s794_s27  ;;  %s800_s17 = sld [smem:[#allocation2 + $0xb]]  ;;  %s1029_s22 = smov 104  }
  0x54   : > { %v246_v16 = vmul.f32 %v243_v11, %v1218_v0  ;;  %v266_v17 = vmul.f32 %v263_v14, %v1218_v0  ;;  %v265_v18 = vmul.f32 %v263_v14, %v1222_v3  ;;  %v285_v20 = vmul.f32 %v283_v19, %v1222_v3  ;;  %s801_s24 = sld [smem:[#allocation2 + $0xc]]  ;;  %s802_s15 = sld [smem:[#allocation2 + $0xd]] }
  0x55   : > { %v284_v21 = vmul.f32 %v283_v19, %v1220_v1  ;;  %v303_v22 = vstv %s795_s29  ;;  %v286_v24 = vmul.f32 %v283_v19, %v1218_v0  ;;  %v323_v27 = vstv %s796_s3  ;;  %s803_s27 = sld [smem:[#allocation2 + $0xe]]  ;;  %s804_s29 = sld [smem:[#allocation2 + $0xf]] }
  0x56   : > { %v304_v23 = vmul.f32 %v303_v22, %v1220_v1  ;;  %v306_v25 = vmul.f32 %v303_v22, %v1218_v0  ;;  %v305_v26 = vmul.f32 %v303_v22, %v1222_v3  ;;  %v325_v28 = vmul.f32 %v323_v27, %v1222_v3  ;;  %s805_s3 = sld [smem:[#allocation2 + $0x10]]  ;;  %p1364_p9 = scmp.ne.s32.totalorder %s1359_s6, 0 }
  0x57   : > { %230 = vrot.lane.b32.xlu1 %v224_v7, %s1022_s26  ;;  %212 = vrot.lane.b32.xlu0 %v205_v8, %s1021_s25  ;;  %v324_v29 = vmul.f32 %v323_v27, %v1220_v1  ;;  %v343_v30 = vstv %s797_s7  ;;  %v326_v32 = vmul.f32 %v323_v27, %v1218_v0  ;;  %v363_v35 = vstv %s798_s14  ;;  %s1030_s25 = smov 88   ;;  %s806_s7 = sld [smem:[#allocation2 + $0x11]] }
  0x58   : > { %v344_v31 = vmul.f32 %v343_v30, %v1220_v1  ;;  %v346_v33 = vmul.f32 %v343_v30, %v1218_v0  ;;  %v345_v34 = vmul.f32 %v343_v30, %v1222_v3  ;;  %v365_v36 = vmul.f32 %v363_v35, %v1222_v3  ;;  %s807_s14 = sld [smem:[#allocation2 + $0x12]] }
  0x59   : > { %v364_v37 = vmul.f32 %v363_v35, %v1220_v1  ;;  %v383_v38 = vstv %s799_s19  ;;  %v366_v40 = vmul.f32 %v363_v35, %v1218_v0  ;;  %v403_v43 = vstv %s800_s17  ;;  %s808_s19 = sld [smem:[#allocation2 + $0x13]]  ;;  %s809_s17 = sld [smem:[#allocation2 + $0x14]] }
  0x5a   : > { %v384_v39 = vmul.f32 %v383_v38, %v1220_v1  ;;  %v386_v41 = vmul.f32 %v383_v38, %v1218_v0  ;;  %v385_v42 = vmul.f32 %v383_v38, %v1222_v3  ;;  %v405_v44 = vmul.f32 %v403_v43, %v1222_v3 }
  0x5b   : > { %234 = vrot.lane.b32.xlu1 %v226_v9, %s1022_s26  ;;  %232 = vrot.lane.b32.xlu0 %v225_v10, %s1022_s26  ;;  %v404_v45 = vmul.f32 %v403_v43, %v1220_v1  ;;  %v423_v46 = vstv %s801_s24  ;;  %s1031_s26 = smov 87   ;;  %v406_v48 = vmul.f32 %v403_v43, %v1218_v0  ;;  %v443_v51 = vstv %s802_s15  ;;  %s172_s24 = sld [smem:[#allocation2]] }
  0x5c   : > { %v424_v47 = vmul.f32 %v423_v46, %v1220_v1  ;;  %v426_v49 = vmul.f32 %v423_v46, %v1218_v0  ;;  %v425_v50 = vmul.f32 %v423_v46, %v1222_v3  ;;  %v445_v52 = vmul.f32 %v443_v51, %v1222_v3  ;;  %s1039_s15 = smov 64  }
  0x5d   : > { %v444_v53 = vmul.f32 %v443_v51, %v1220_v1  ;;  %v463_v54 = vstv %s803_s27  ;;  %v446_v56 = vmul.f32 %v443_v51, %v1218_v0  ;;  %v483_v59 = vstv %s804_s29  ;;  %s1040_s27 = smov 48   ;;  %s1041_s29 = smov 47  }
  0x5e   : > { %v464_v55 = vmul.f32 %v463_v54, %v1220_v1  ;;  %v466_v57 = vmul.f32 %v463_v54, %v1218_v0  ;;  %v465_v58 = vmul.f32 %v463_v54, %v1222_v3  ;;  %v485_v60 = vmul.f32 %v483_v59, %v1222_v3 }
  0x5f   : > { %252 = vrot.lane.b32.xlu1 %v245_v12, %s1023_s28  ;;  %250 = vrot.lane.b32.xlu0 %v244_v13, %s1023_s28  ;;  %v484_v61 = vmul.f32 %v483_v59, %v1220_v1  ;;  %v503_v62 = vstv %s805_s3  ;;  %v486_v2 = vmul.f32 %v483_v59, %v1218_v0  ;;  %v523_v6 = vstv %s806_s7  ;;  %s1042_s3 = smov 46   ;;  %s1044_s7 = smov 44  }
  0x60   : > { %v504_v63 = vmul.f32 %v503_v62, %v1220_v1  ;;  %v506_v4 = vmul.f32 %v503_v62, %v1218_v0  ;;  %v505_v5 = vmul.f32 %v503_v62, %v1222_v3  ;;  %v525_v7 = vmul.f32 %v523_v6, %v1222_v3 }
  0x61   : > { %v524_v8 = vmul.f32 %v523_v6, %v1220_v1  ;;  %v543_v9 = vstv %s807_s14  ;;  %v526_v11 = vmul.f32 %v523_v6, %v1218_v0  ;;  %v563_v14 = vstv %s808_s19  ;;  %s819_s14 = sshll.u32 %s1082_s13, 8  ;;  %s686_s13 = scalar_lea.sflag [#allocation4], %s1210_s21 }
  0x62   : > { %v544_v10 = vmul.f32 %v543_v9, %v1220_v1  ;;  %v546_v12 = vmul.f32 %v543_v9, %v1218_v0  ;;  %v545_v13 = vmul.f32 %v543_v9, %v1222_v3  ;;  %v566_v19 = vmul.f32 %v563_v14, %v1218_v0 }
  0x63   : > { %270 = vrot.lane.b32.xlu1 %v264_v15, %s1024_s30  ;;  %254 = vrot.lane.b32.xlu0 %v246_v16, %s1023_s28  ;;  %s1032_s28 = smov 86   ;;  %v565_v15 = vmul.f32 %v563_v14, %v1222_v3  ;;  %v564_v16 = vmul.f32 %v563_v14, %v1220_v1  ;;  %v199_v22 = vstv %s172_s24 }
  0x64   : > { %v201_v27 = vmul.f32 %v199_v22, %v1222_v3 }
  0x67   : > { %274 = vrot.lane.b32.xlu1 %v266_v17, %s1024_s30  ;;  %272 = vrot.lane.b32.xlu0 %v265_v18, %s1024_s30  ;;  %s1033_s30 = smov 85   ;;  %v583_v17 = vstv %s809_s17 }
  0x68   : > { %v584_v18 = vmul.f32 %v583_v17, %v1220_v1 }
  0x6b   : > { %292 = vrot.lane.b32.xlu1 %v285_v20, %s1025_s4  ;;  %290 = vrot.lane.b32.xlu0 %v284_v21, %s1025_s4  ;;  %v586_v20 = vmul.f32 %v583_v17, %v1218_v0  ;;  %v585_v21 = vmul.f32 %v583_v17, %v1222_v3 }
  0x6f   : > { %310 = vrot.lane.b32.xlu1 %v304_v23, %s1026_s8  ;;  %294 = vrot.lane.b32.xlu0 %v286_v24, %s1025_s4  ;;  %s1034_s4 = smov 84  }
  0x73   : > { %314 = vrot.lane.b32.xlu1 %v306_v25, %s1026_s8  ;;  %312 = vrot.lane.b32.xlu0 %v305_v26, %s1026_s8  ;;  %s1035_s8 = smov 68   ;;  %v200_v26 = vmul.f32 %v199_v22, %v1220_v1 }
  0x77   : > { %332 = vrot.lane.b32.xlu1 %v325_v28, %s1027_s20  ;;  %330 = vrot.lane.b32.xlu0 %v324_v29, %s1027_s20 }
  0x7b   : > { %350 = vrot.lane.b32.xlu1 %v344_v31, %s1028_s23  ;;  %334 = vrot.lane.b32.xlu0 %v326_v32, %s1027_s20  ;;  %s1036_s20 = smov 67  }
  0x7f   : > { %354 = vrot.lane.b32.xlu1 %v346_v33, %s1028_s23  ;;  %352 = vrot.lane.b32.xlu0 %v345_v34, %s1028_s23  ;;  %s1037_s23 = smov 66  }
  0x83   : > { %372 = vrot.lane.b32.xlu1 %v365_v36, %s1029_s22  ;;  %370 = vrot.lane.b32.xlu0 %v364_v37, %s1029_s22 }
  0x87   : > { %390 = vrot.lane.b32.xlu1 %v384_v39, %s1030_s25  ;;  %374 = vrot.lane.b32.xlu0 %v366_v40, %s1029_s22  ;;  %s1038_s22 = smov 65  }
  0x8b   : > { %394 = vrot.lane.b32.xlu1 %v386_v41, %s1030_s25  ;;  %392 = vrot.lane.b32.xlu0 %v385_v42, %s1030_s25  ;;  %s810_s25 = sld [smem:[#allocation2 + $0x15]] }
  0x8f   : > { %412 = vrot.lane.b32.xlu1 %v405_v44, %s1031_s26  ;;  %410 = vrot.lane.b32.xlu0 %v404_v45, %s1031_s26 }
  0x91   : > { %v603_v23 = vstv %s810_s25  ;;  %s1045_s25 = smov [#allocation7]  }
  0x92   : > { %v605_v28 = vmul.f32 %v603_v23, %v1222_v3  ;;  %v604_v29 = vmul.f32 %v603_v23, %v1220_v1  ;;  %v606_v38 = vmul.f32 %v603_v23, %v1218_v0 }
  0x93   : > { %430 = vrot.lane.b32.xlu1 %v424_v47, %s1032_s28  ;;  %414 = vrot.lane.b32.xlu0 %v406_v48, %s1031_s26  ;;  %s811_s26 = sld [smem:[#allocation2 + $0x16]] }
  0x97   : > { %434 = vrot.lane.b32.xlu1 %v426_v49, %s1032_s28  ;;  %432 = vrot.lane.b32.xlu0 %v425_v50, %s1032_s28  ;;  %s812_s28 = sld [smem:[#allocation2 + $0x17]] }
  0x99   : > { %v623_v30 = vstv %s811_s26 }
  0x9a   : > { %v624_v35 = vmul.f32 %v623_v30, %v1220_v1  ;;  %v626_v43 = vmul.f32 %v623_v30, %v1218_v0  ;;  %v625_v46 = vmul.f32 %v623_v30, %v1222_v3 }
  0x9b   : > { %452 = vrot.lane.b32.xlu1 %v445_v52, %s1033_s30  ;;  %450 = vrot.lane.b32.xlu0 %v444_v53, %s1033_s30 }
  0x9d   : > { %v643_v47 = vstv %s812_s28 }
  0x9e   : > { %v645_v52 = vmul.f32 %v643_v47, %v1222_v3  ;;  %v644_v53 = vmul.f32 %v643_v47, %v1220_v1 }
  0x9f   : > { %470 = vrot.lane.b32.xlu1 %v464_v55, %s1034_s4  ;;  %454 = vrot.lane.b32.xlu0 %v446_v56, %s1033_s30  ;;  %s813_s30 = sld [smem:[#allocation2 + $0x18]] }
  0xa3   : > { %474 = vrot.lane.b32.xlu1 %v466_v57, %s1034_s4  ;;  %472 = vrot.lane.b32.xlu0 %v465_v58, %s1034_s4  ;;  %s1043_s4 = smov 45  }
  0xa5   : > { %v663_v54 = vstv %s813_s30 }
  0xa6   : > { %v664_v59 = vmul.f32 %v663_v54, %v1220_v1 }
  0xa7   : > { %492 = vrot.lane.b32.xlu1 %v485_v60, %s1035_s8  ;;  %490 = vrot.lane.b32.xlu0 %v484_v61, %s1035_s8  ;;  %v646_v60 = vmul.f32 %v643_v47, %v1218_v0 }
  0xab   : > { %510 = vrot.lane.b32.xlu1 %v504_v63, %s1036_s20  ;;  %494 = vrot.lane.b32.xlu0 %v486_v2, %s1035_s8  ;;  %s789_s8 = sshll.u32 %s1210_s21, 4 }
  0xaf   : > { %514 = vrot.lane.b32.xlu1 %v506_v4, %s1036_s20  ;;  %512 = vrot.lane.b32.xlu0 %v505_v5, %s1036_s20  ;;  %v666_v4 = vmul.f32 %v663_v54, %v1218_v0  ;;  %s171_s20 = scalar_lea.vmem [#allocation7], %s789_s8 }
  0xb0   : > { %s700_s19 = sshll.u32 %s171_s20, 4  ;;  %s1305_s19 = int_to_ptr.vmem [resolvable:$true] %s700_s19 }
  0xb1   : > { %s947_s24 = scalar_lea.vmem %s1305_s19, 256 }
  0xb2   : > { %p948_p8 = scmp.ne.s32.totalorder %s1305_s19, %s947_s24 }
  0xb3   : > { %532 = vrot.lane.b32.xlu1 %v525_v7, %s1037_s23  ;;  %530 = vrot.lane.b32.xlu0 %v524_v8, %s1037_s23  ;;  %v665_v7 = vmul.f32 %v663_v54, %v1222_v3 }
  0xb4   : > { %p949_p5 = pnand %p948_p8, %p1364_p9 }
  0xb6   : > { %p950_p0 = pneg %p949_p5 }
  0xb7   : > { %550 = vrot.lane.b32.xlu1 %v544_v10, %s1038_s22  ;;  %534 = vrot.lane.b32.xlu0 %v526_v11, %s1037_s23 }
  0xbb   : > { %554 = vrot.lane.b32.xlu1 %v546_v12, %s1038_s22  ;;  %552 = vrot.lane.b32.xlu0 %v545_v13, %s1038_s22  ;;  %s1303_s22 = scalar_lea.hbm %s1349_s2, %s819_s14 }
  0xbf   : > { %572 = vrot.lane.b32.xlu1 %v565_v15, %s1039_s15  ;;  %570 = vrot.lane.b32.xlu0 %v564_v16, %s1039_s15 }
  0xc3   : > { %590 = vrot.lane.b32.xlu1 %v584_v18, %s1040_s27  ;;  %574 = vrot.lane.b32.xlu0 %v566_v19, %s1039_s15  ;;  %s951_s15 = sshll.u32 %s1045_s25, 4  ;;  %s952_s15 = int_to_ptr.vmem [resolvable:$false] %s951_s15 }
  0xc4   : > { %s953_s26 = scalar_lea.vmem %s952_s15, 512  ;;  %p954_p1 = scmp.lt.s32.totalorder %s1305_s19, %s952_s15 }
  0xc5   : > { %v215_v24 = vpop.permute.xlu1 %214  ;;  %v211_v25 = vpop.permute.xlu0 %210  ;;  %p955_p2 = scmp.lt.s32.totalorder %s953_s26, %s947_s24 }
  0xc7   : > { %594 = vrot.lane.b32.xlu1 %v586_v20, %s1040_s27  ;;  %592 = vrot.lane.b32.xlu0 %v585_v21, %s1040_s27  ;;  %p956_p11 = por %p955_p2, %p954_p1 }
  0xc9   : > { %v231_v31 = vpop.permute.xlu1 %230  ;;  %v213_v32 = vpop.permute.xlu0 %212  ;;  %p957_p13 = pnand %p956_p11, %p950_p0 }
  0xca   : > { %v217_v33 = vsel %vm216_vm0, %v211_v25, %v213_v32  ;;  %v218_v34 = vsel %vm216_vm0, %v213_v32, %v215_v24  ;;  %vm536_vm0 = vcmask 539648  }
  0xcb   : > { %v221_v36 = vadd.f32 %v217_v33, %v200_v26  ;;  %v222_v37 = vadd.f32 %v218_v34, %v201_v27  ;;  %612 = vrot.lane.b32.xlu1 %v605_v28, %s1041_s29  ;;  %610 = vrot.lane.b32.xlu0 %v604_v29, %s1041_s29 }
  0xcd   : > { %v235_v39 = vpop.permute.xlu1 %234  ;;  %v233_v40 = vpop.permute.xlu0 %232 }
  0xce   : > { %v237_v41 = vsel %vm236_vm1, %v231_v31, %v233_v40  ;;  %v238_v42 = vsel %vm236_vm1, %v233_v40, %v235_v39  ;;  %vm556_vm1 = vcmask 531456  }
  0xcf   : > { %v241_v44 = vadd.f32 %v237_v41, %v221_v36  ;;  %v242_v45 = vadd.f32 %v238_v42, %v222_v37  ;;  %630 = vrot.lane.b32.xlu1 %v624_v35, %s1042_s3  ;;  %614 = vrot.lane.b32.xlu0 %v606_v38, %s1041_s29 }
  0xd1   : > { %v253_v48 = vpop.permute.xlu1 %252  ;;  %v251_v49 = vpop.permute.xlu0 %250 }
  0xd2   : > { %v257_v50 = vsel %vm256_vm2, %v251_v49, %v253_v48 }
  0xd3   : > { %v261_v51 = vadd.f32 %v257_v50, %v241_v44  ;;  %634 = vrot.lane.b32.xlu1 %v626_v43, %s1042_s3  ;;  %632 = vrot.lane.b32.xlu0 %v625_v46, %s1042_s3 }
  0xd5   : > { %v271_v55 = vpop.permute.xlu1 %270  ;;  %v255_v56 = vpop.permute.xlu0 %254 }
  0xd6   : > { %v258_v57 = vsel %vm256_vm2, %v253_v48, %v255_v56  ;;  %vm576_vm2 = vcmask 523264  }
  0xd7   : > { %v262_v58 = vadd.f32 %v258_v57, %v242_v45  ;;  %652 = vrot.lane.b32.xlu1 %v645_v52, %s1043_s4  ;;  %650 = vrot.lane.b32.xlu0 %v644_v53, %s1043_s4 }
  0xd9   : > { %v275_v61 = vpop.permute.xlu1 %274  ;;  %v273_v62 = vpop.permute.xlu0 %272 }
  0xda   : > { %v277_v63 = vsel %vm276_vm3, %v271_v55, %v273_v62  ;;  %v278_v2 = vsel %vm276_vm3, %v273_v62, %v275_v61  ;;  %vm596_vm3 = vcmask 392192  }
  0xdb   : > { %v281_v5 = vadd.f32 %v277_v63, %v261_v51  ;;  %v282_v6 = vadd.f32 %v278_v2, %v262_v58  ;;  %670 = vrot.lane.b32.xlu1 %v664_v59, %s1044_s7  ;;  %654 = vrot.lane.b32.xlu0 %v646_v60, %s1043_s4 }
  0xdd   : > { %v293_v8 = vpop.permute.xlu1 %292  ;;  %v291_v9 = vpop.permute.xlu0 %290 }
  0xde   : > { %v297_v10 = vsel %vm296_vm4, %v291_v9, %v293_v8 }
  0xdf   : > { %v301_v1 = vadd.f32 %v297_v10, %v281_v5  ;;  %674 = vrot.lane.b32.xlu1 %v666_v4, %s1044_s7  ;;  %672 = vrot.lane.b32.xlu0 %v665_v7, %s1044_s7 }
  0xe1   : > { %v311_v11 = vpop.permute.xlu1 %310  ;;  %v295_v12 = vpop.permute.xlu0 %294 }
  0xe2   : > { %v298_v13 = vsel %vm296_vm4, %v293_v8, %v295_v12  ;;  %vm616_vm4 = vcmask 384000  }
  0xe3   : > { %v302_v14 = vadd.f32 %v298_v13, %v282_v6 }
  0xe5   : > { %v315_v0 = vpop.permute.xlu1 %314  ;;  %v313_v15 = vpop.permute.xlu0 %312 }
  0xe6   : > { %v317_v16 = vsel %vm316_vm5, %v311_v11, %v313_v15  ;;  %v318_v17 = vsel %vm316_vm5, %v313_v15, %v315_v0  ;;  %vm636_vm5 = vcmask 375808  }
  0xe7   : > { %v321_v18 = vadd.f32 %v317_v16, %v301_v1  ;;  %v322_v19 = vadd.f32 %v318_v17, %v302_v14 }
  0xe9   : > { %v333_v20 = vpop.permute.xlu1 %332  ;;  %v331_v3 = vpop.permute.xlu0 %330 }
  0xea   : > { %v337_v21 = vsel %vm336_vm6, %v331_v3, %v333_v20 }
  0xeb   : > { %v341_v22 = vadd.f32 %v337_v21, %v321_v18 }
  0xed   : > { %v351_v23 = vpop.permute.xlu1 %350  ;;  %v335_v24 = vpop.permute.xlu0 %334 }
  0xee   : > { %v338_v25 = vsel %vm336_vm6, %v333_v20, %v335_v24  ;;  %vm656_vm6 = vcmask 367616  }
  0xef   : > { %v342_v26 = vadd.f32 %v338_v25, %v322_v19 }
  0xf1   : > { %v355_v27 = vpop.permute.xlu1 %354  ;;  %v353_v28 = vpop.permute.xlu0 %352 }
  0xf2   : > { %v357_v29 = vsel %vm356_vm7, %v351_v23, %v353_v28  ;;  %v358_v30 = vsel %vm356_vm7, %v353_v28, %v355_v27  ;;  %vm676_vm7 = vcmask 359424  }
  0xf3   : > { %v361_v31 = vadd.f32 %v357_v29, %v341_v22  ;;  %v362_v32 = vadd.f32 %v358_v30, %v342_v26 }
  0xf5   : > { %v373_v33 = vpop.permute.xlu1 %372  ;;  %v371_v34 = vpop.permute.xlu0 %370 }
  0xf6   : > { %v377_v4 = vsel %vm376_vm8, %v371_v34, %v373_v33 }
  0xf7   : > { %v381_v8 = vadd.f32 %v377_v4, %v361_v31 }
  0xf9   : > { %v391_v35 = vpop.permute.xlu1 %390  ;;  %v375_v36 = vpop.permute.xlu0 %374 }
  0xfa   : > { %v378_v5 = vsel %vm376_vm8, %v373_v33, %v375_v36 }
  0xfb   : > { %v382_v9 = vadd.f32 %v378_v5, %v362_v32 }
  0xfd   : > { %v395_v37 = vpop.permute.xlu1 %394  ;;  %v393_v38 = vpop.permute.xlu0 %392 }
  0xfe   : > { %v397_v6 = vsel %vm396_vm9, %v391_v35, %v393_v38  ;;  %v398_v7 = vsel %vm396_vm9, %v393_v38, %v395_v37 }
  0xff   : > { %v401_v13 = vadd.f32 %v397_v6, %v381_v8  ;;  %v402_v14 = vadd.f32 %v398_v7, %v382_v9 }
 0x101   : > { %v413_v39 = vpop.permute.xlu1 %412  ;;  %v411_v40 = vpop.permute.xlu0 %410 }
 0x102   : > { %v417_v11 = vsel %vm416_vm10, %v411_v40, %v413_v39 }
 0x103   : > { %v421_v16 = vadd.f32 %v417_v11, %v401_v13 }
 0x105   : > { %v431_v41 = vpop.permute.xlu1 %430  ;;  %v415_v42 = vpop.permute.xlu0 %414 }
 0x106   : > { %v418_v12 = vsel %vm416_vm10, %v413_v39, %v415_v42 }
 0x107   : > { %v422_v17 = vadd.f32 %v418_v12, %v402_v14 }
 0x109   : > { %v435_v43 = vpop.permute.xlu1 %434  ;;  %v433_v44 = vpop.permute.xlu0 %432 }
 0x10a   : > { %v437_v0 = vsel %vm436_vm11, %v431_v41, %v433_v44  ;;  %v438_v15 = vsel %vm436_vm11, %v433_v44, %v435_v43 }
 0x10b   : > { %v441_v21 = vadd.f32 %v437_v0, %v421_v16  ;;  %v442_v22 = vadd.f32 %v438_v15, %v422_v17 }
 0x10d   : > { %v453_v45 = vpop.permute.xlu1 %452  ;;  %v451_v46 = vpop.permute.xlu0 %450 }
 0x10e   : > { %v457_v20 = vsel %vm456_vm12, %v451_v46, %v453_v45 }
 0x10f   : > { %v461_v25 = vadd.f32 %v457_v20, %v441_v21 }
 0x111   : > { %v471_v47 = vpop.permute.xlu1 %470  ;;  %v455_v48 = vpop.permute.xlu0 %454 }
 0x112   : > { %v458_v3 = vsel %vm456_vm12, %v453_v45, %v455_v48 }
 0x113   : > { %v462_v26 = vadd.f32 %v458_v3, %v442_v22 }
 0x115   : > { %v475_v49 = vpop.permute.xlu1 %474  ;;  %v473_v50 = vpop.permute.xlu0 %472 }
 0x116   : > { %v477_v23 = vsel %vm476_vm13, %v471_v47, %v473_v50  ;;  %v478_v24 = vsel %vm476_vm13, %v473_v50, %v475_v49 }
 0x117   : > { %v481_v31 = vadd.f32 %v477_v23, %v461_v25  ;;  %v482_v32 = vadd.f32 %v478_v24, %v462_v26 }
 0x119   : > { %v493_v51 = vpop.permute.xlu1 %492  ;;  %v491_v52 = vpop.permute.xlu0 %490 }
 0x11a   : > { %v497_v29 = vsel %vm496_vm14, %v491_v52, %v493_v51 }
 0x11b   : > { %v501_v35 = vadd.f32 %v497_v29, %v481_v31 }
 0x11d   : > { %v511_v53 = vpop.permute.xlu1 %510  ;;  %v495_v54 = vpop.permute.xlu0 %494 }
 0x11e   : > { %v498_v30 = vsel %vm496_vm14, %v493_v51, %v495_v54 }
 0x11f   : > { %v502_v36 = vadd.f32 %v498_v30, %v482_v32 }
 0x121   : > { %v515_v55 = vpop.permute.xlu1 %514  ;;  %v513_v56 = vpop.permute.xlu0 %512 }
 0x122   : > { %v517_v33 = vsel %vm516_vm15, %v511_v53, %v513_v56  ;;  %v518_v34 = vsel %vm516_vm15, %v513_v56, %v515_v55 }
 0x123   : > { %v521_v41 = vadd.f32 %v517_v33, %v501_v35  ;;  %v522_v42 = vadd.f32 %v518_v34, %v502_v36 }
 0x125   : > { %v533_v57 = vpop.permute.xlu1 %532  ;;  %v531_v58 = vpop.permute.xlu0 %530 }
 0x126   : > { %v537_v39 = vsel %vm536_vm0, %v531_v58, %v533_v57 }
 0x127   : > { %v541_v45 = vadd.f32 %v537_v39, %v521_v41 }
 0x129   : > { %v551_v59 = vpop.permute.xlu1 %550  ;;  %v535_v60 = vpop.permute.xlu0 %534 }
 0x12a   : > { %v538_v40 = vsel %vm536_vm0, %v533_v57, %v535_v60 }
 0x12b   : > { %v542_v46 = vadd.f32 %v538_v40, %v522_v42 }
 0x12d   : > { %v555_v61 = vpop.permute.xlu1 %554  ;;  %v553_v62 = vpop.permute.xlu0 %552 }
 0x12e   : > { %v557_v43 = vsel %vm556_vm1, %v551_v59, %v553_v62  ;;  %v558_v44 = vsel %vm556_vm1, %v553_v62, %v555_v61 }
 0x12f   : > { %v561_v51 = vadd.f32 %v557_v43, %v541_v45  ;;  %v562_v52 = vadd.f32 %v558_v44, %v542_v46 }
 0x131   : > { %v573_v63 = vpop.permute.xlu1 %572  ;;  %v571_v2 = vpop.permute.xlu0 %570 }
 0x132   : > { %v577_v49 = vsel %vm576_vm2, %v571_v2, %v573_v63 }
 0x133   : > { %v581_v55 = vadd.f32 %v577_v49, %v561_v51 }
 0x135   : > { %v591_v10 = vpop.permute.xlu1 %590  ;;  %v575_v1 = vpop.permute.xlu0 %574 }
 0x136   : > { %v578_v50 = vsel %vm576_vm2, %v573_v63, %v575_v1 }
 0x137   : > { %v582_v56 = vadd.f32 %v578_v50, %v562_v52 }
 0x139   : > { %v595_v18 = vpop.permute.xlu1 %594  ;;  %v593_v19 = vpop.permute.xlu0 %592 }
 0x13a   : > { %v597_v53 = vsel %vm596_vm3, %v591_v10, %v593_v19  ;;  %v598_v54 = vsel %vm596_vm3, %v593_v19, %v595_v18 }
 0x13b   : > { %v601_v61 = vadd.f32 %v597_v53, %v581_v55  ;;  %v602_v62 = vadd.f32 %v598_v54, %v582_v56 }
 0x13d   : > { %v613_v27 = vpop.permute.xlu1 %612  ;;  %v611_v28 = vpop.permute.xlu0 %610 }
 0x13e   : > { %v617_v59 = vsel %vm616_vm4, %v611_v28, %v613_v27 }
 0x13f   : > { %v621_v63 = vadd.f32 %v617_v59, %v601_v61 }
 0x141   : > { %v631_v37 = vpop.permute.xlu1 %630  ;;  %v615_v38 = vpop.permute.xlu0 %614 }
 0x142   : > { %v618_v60 = vsel %vm616_vm4, %v613_v27, %v615_v38 }
 0x143   : > { %v622_v5 = vadd.f32 %v618_v60, %v602_v62 }
 0x145   : > { %v635_v47 = vpop.permute.xlu1 %634  ;;  %v633_v48 = vpop.permute.xlu0 %632 }
 0x146   : > { %v637_v4 = vsel %vm636_vm5, %v631_v37, %v633_v48  ;;  %v638_v2 = vsel %vm636_vm5, %v633_v48, %v635_v47 }
 0x147   : > { %v641_v10 = vadd.f32 %v637_v4, %v621_v63  ;;  %v642_v1 = vadd.f32 %v638_v2, %v622_v5 }
 0x149   : > { %v653_v57 = vpop.permute.xlu1 %652  ;;  %v651_v58 = vpop.permute.xlu0 %650 }
 0x14a   : > { %v657_v8 = vsel %vm656_vm6, %v651_v58, %v653_v57 }
 0x14b   : > { %v661_v11 = vadd.f32 %v657_v8, %v641_v10 }
 0x14d   : > { %v671_v6 = vpop.permute.xlu1 %670  ;;  %v655_v7 = vpop.permute.xlu0 %654 }
 0x14e   : > { %v658_v9 = vsel %vm656_vm6, %v653_v57, %v655_v7 }
 0x14f   : > { %v662_v12 = vadd.f32 %v658_v9, %v642_v1 }
 0x151   : > { %v675_v13 = vpop.permute.xlu1 %674  ;;  %v673_v14 = vpop.permute.xlu0 %672 }
 0x152   : > { %v677_v0 = vsel %vm676_vm7, %v671_v6, %v673_v14  ;;  %v678_v15 = vsel %vm676_vm7, %v673_v14, %v675_v13 }
 0x153   : > { %v681_v16 = vadd.f32 %v677_v0, %v661_v11  ;;  %v682_v17 = vadd.f32 %v678_v15, %v662_v12 }
 0x155   : > { %683 = vst [vmem:[%s171_s20] sm:$0xff] %v681_v16  ;;  %684 = vst [vmem:[%s171_s20 + $0x8] sm:$0xff] %v682_v17 }
 0x156   : > { %960 = shalt.err (!%p957_p13)
}
 0x157   : > { %s961_s21 = scalar_lea.hbm %s1303_s22, 256  ;;  %s965_s29 = scalar_lea.hbm %s1349_s2, 512 }
 0x158   : > { %p962_p3 = scmp.ne.s32.totalorder %s1303_s22, %s961_s21  ;;  %p966_p6 = scmp.lt.u32.totalorder %s1303_s22, %s1349_s2 }
 0x159   : > { %p967_p12 = scmp.lt.u32.totalorder %s965_s29, %s961_s21  ;;  %p969_p8 = scmp.lt.u32.totalorder %s961_s21, %s1303_s22 }
 0x15a   : > { %p963_p7 = pnand %p962_p3, %p1364_p9 }
 0x15b   : > { %p968_p4 = por %p967_p12, %p966_p6 }
 0x15c   : > { %p964_p10 = pneg %p963_p7 }
 0x15d   : > { %p970_p5 = por %p969_p8, %p968_p4 }
 0x15f   : > { %p971_p0 = pnand %p970_p5, %p964_p10 }
 0x161   : > { %974 = shalt.err (!%p971_p0)
}
 0x162   : > { %829 = dma.vmem_to_hbm [thread:$0]  (%p1364_p9), %s1305_s19, 256, %s1303_s22, %s686_s13  }
 0x163 PF: > { %s712_s4 = sand.u32 1, %s1005_s9   ;;  %p1365_p1 = scmp.ne.s32.totalorder %s1354_s16, 0 }
 0x164   : > { %p1366_p2 = scmp.ge.s32.totalorder %s1017_s12, 2  ;;  %s713_s7 = scalar_lea.sflag [#allocation4], %s712_s4 }
 0x166   : > { %p840_p11 = pnand %p1366_p2, %p1365_p1 }
 0x168   : > { %1000 = dma.done.wait (!%p840_p11), %s713_s7, 256  }
 0x169   : > { %1002 = vsyncadd (!%p840_p11), %s713_s7, 4294967040  ;;  %p16_p13 = scmp.ge.s32.totalorder %s1107_s18, 4   ;;  %s1367_s9 = smov %s1009_s10 }
 0x16a   : > { %s1368_s10 = smov %s1013_s11  ;;  %s1369_s11 = smov %s1147_s5 }
 0x16b   : > { %s1370_s12 = smov %s1107_s18  ;;  %18 = sbr.rel (!%p16_p13) target bundleno = 6 (0x6), region = 78 }
 0x172   :  { %718 = vsyncpa [#allocation3], 1 }
 0x173   :  { %720 = vsyncpa [#allocation3 + $0x1], 1 }
 0x174   :  { %721 = vsyncpa [#allocation4], 1 }
 0x175   :  { %723 = vsyncpa [#allocation4 + $0x1], 1 }
 0x176   :  { %724 = vsyncpa [#allocation5], 1 }
 0x177   :  { %726 = vsyncpa [#allocation5 + $0x1], 1 }

</bundles_post_ra>
